<compile_context>
chip_gen: v6e
topology: v6e:2x2x1
jax: 0.10.0
libtpu: 0.0.40
codegen_flags: <defaults>
</compile_context>

<pallas_src>
import jax
import jax.numpy as jnp
from jax.experimental import pallas as pl
from jax.experimental.pallas import tpu as pltpu


def _round_up(x, m):
    return ((x + m - 1) // m) * m


# ----------------------------------------------------------------------------
# Kernels
# ----------------------------------------------------------------------------
def _joint_hidden_kernel(t_ref, p_ref, w1t_ref, w1p_ref, b1_ref, w2_ref, b2_ref,
                         out_ref):
    """hidden_size > 0 path.

    t_ref  : [bm, T]  (activation block, cast to bf16 in-kernel)
    p_ref  : [bm, P]
    w1t_ref: [T, Hpad]  W1[:, :T]^T  (bf16, zero-padded H)
    w1p_ref: [P, Hpad]  W1[:, T:]^T  (bf16)
    b1_ref : [1, Hpad]  (f32)
    w2_ref : [Hpad, Cpad]  W2^T       (bf16, zero-padded)
    b2_ref : [1, Cpad]  (f32)
    """
    cdt = w1t_ref.dtype
    t = t_ref[...].astype(cdt)
    p = p_ref[...].astype(cdt)
    # First layer as two K-slab MXU pushes, f32 accumulation, broadcast bias.
    h = jnp.dot(t, w1t_ref[...], preferred_element_type=jnp.float32)
    h = h + jnp.dot(p, w1p_ref[...], preferred_element_type=jnp.float32)
    h = h + b1_ref[...]
    # Padded H columns are tanh(0)=0 and hit zero rows of w2 -> benign.
    proj = jnp.tanh(h).astype(w2_ref.dtype)          # EUP; back to bf16 for MXU
    out = jnp.dot(proj, w2_ref[...], preferred_element_type=jnp.float32) + b2_ref[...]
    out_ref[...] = out.astype(out_ref.dtype)


def _joint_nohidden_kernel(t_ref, p_ref, w2t_ref, w2p_ref, b2_ref, out_ref):
    """hidden_size == 0 path: dense layer only, W2 split at row T."""
    cdt = w2t_ref.dtype
    t = t_ref[...].astype(cdt)
    p = p_ref[...].astype(cdt)
    out = jnp.dot(t, w2t_ref[...], preferred_element_type=jnp.float32)
    out = out + jnp.dot(p, w2p_ref[...], preferred_element_type=jnp.float32)
    out = out + b2_ref[...]
    out_ref[...] = out.astype(out_ref.dtype)


# ----------------------------------------------------------------------------
# One-time parameter packing (hoisted out of the hot path)
# ----------------------------------------------------------------------------
def prepare_joint_params(params, trans_size, pred_size, compute_dtype=jnp.bfloat16):
    """Pack PyTorch-convention params ([out, in] weights) into kernel-ready,
    pre-transposed, K-split, lane-dense (128-padded) bf16 arrays.  Biases stay
    f32 (they add onto the f32 accumulator).  Call once and reuse."""
    T, P = trans_size, pred_size
    w2 = jnp.asarray(params["w2"], jnp.float32)   # [C, proj]
    b2 = jnp.asarray(params["b2"], jnp.float32)   # [C]
    C = w2.shape[0]
    Cpad = _round_up(C, 128)
    b2_pad = jnp.zeros((1, Cpad), jnp.float32).at[0, :C].set(b2)

    if params.get("w1", None) is not None:
        w1 = jnp.asarray(params["w1"], jnp.float32)   # [H, T+P]
        b1 = jnp.asarray(params["b1"], jnp.float32)   # [H]
        H = w1.shape[0]
        Hpad = _round_up(H, 128)
        w1t = jnp.zeros((T, Hpad), jnp.float32).at[:, :H].set(w1[:, :T].T)
        w1p = jnp.zeros((P, Hpad), jnp.float32).at[:, :H].set(w1[:, T:].T)
        b1_pad = jnp.zeros((1, Hpad), jnp.float32).at[0, :H].set(b1)
        w2_pad = jnp.zeros((Hpad, Cpad), jnp.float32).at[:H, :C].set(w2.T)
        return {"kind": "hidden",
                "w1t": w1t.astype(compute_dtype),
                "w1p": w1p.astype(compute_dtype),
                "b1": b1_pad,
                "w2": w2_pad.astype(compute_dtype),
                "b2": b2_pad,
                "C": C, "Cpad": Cpad, "Hpad": Hpad,
                "compute_dtype": compute_dtype}
    else:
        # project_size == T+P: split the dense weight at row T as well.
        w2t = jnp.zeros((T, Cpad), jnp.float32).at[:, :C].set(w2[:, :T].T)
        w2p = jnp.zeros((P, Cpad), jnp.float32).at[:, :C].set(w2[:, T:].T)
        return {"kind": "nohidden",
                "w2t": w2t.astype(compute_dtype),
                "w2p": w2p.astype(compute_dtype),
                "b2": b2_pad,
                "C": C, "Cpad": Cpad,
                "compute_dtype": compute_dtype}


# ----------------------------------------------------------------------------
# Forward wrapper
# ----------------------------------------------------------------------------
def joint_network_forward(trans_output, pred_output, prepared, *,
                          block_m=None, slice_output=True):
    """Pallas forward.  `prepared` comes from prepare_joint_params (called once).
    Dropout with ratio 0.0 is the identity (PyTorch eval / ratio=0) -> omitted.
    """
    B, T = trans_output.shape
    Bp, P = pred_output.shape
    assert Bp == B, "batch mismatch between trans_output and pred_output"
    C, Cpad = prepared["C"], prepared["Cpad"]
    cdt = prepared["compute_dtype"]

    # Batch tiling:
    #  * small B: one fat block (grid=(1,)) -> per-step overhead paid once.
    #  * large B: 512-row blocks (256 when Cpad is large), capped at ceil(B/2)
    #    so "parallel" shards across both v7x TensorCores (>=2 grid steps).
    if block_m is None:
        block_m = min(512 if Cpad <= 2048 else 256, _round_up(B, 8))
        if B >= 128:
            block_m = min(block_m, _round_up(pl.cdiv(B, 2), 8))
    block_m = max(8, _round_up(block_m, 8))

    t, p = trans_output, pred_output          # no wrapper cast: kernel casts in VMEM
    Bpad = _round_up(B, block_m)
    if Bpad != B:
        t = jnp.pad(t, ((0, Bpad - B), (0, 0)))
        p = jnp.pad(p, ((0, Bpad - B), (0, 0)))
    grid = (Bpad // block_m,)

    t_spec = pl.BlockSpec((block_m, T), lambda i: (i, 0))
    p_spec = pl.BlockSpec((block_m, P), lambda i: (i, 0))
    out_spec = pl.BlockSpec((block_m, Cpad), lambda i: (i, 0))

    def const_spec(arr):
        # Resident (constant-index) parameter block: single-buffer it so it
        # costs 1x VMEM instead of the default 2x.
        return pl.BlockSpec(arr.shape, lambda i: (0,) * arr.ndim,
                            pipeline_mode=pl.Buffered(1))

    if prepared["kind"] == "hidden":
        weights = (prepared["w1t"], prepared["w1p"], prepared["b1"],
                   prepared["w2"], prepared["b2"])
        kernel = _joint_hidden_kernel
    else:
        weights = (prepared["w2t"], prepared["w2p"], prepared["b2"])
        kernel = _joint_nohidden_kernel

    # VMEM budget: single-buffered resident weights + double-buffered
    # activation/output blocks + headroom; capped at 64 MiB (valid on v7x).
    in_item = jnp.dtype(trans_output.dtype).itemsize
    weight_bytes = sum(int(w.size) * w.dtype.itemsize for w in weights)
    act_bytes = 2 * block_m * (T + P) * in_item + 2 * block_m * Cpad * 4
    vmem_limit = int(min(max(weight_bytes + act_bytes + (4 << 20), 16 << 20), 64 << 20))

    out = pl.pallas_call(
        kernel,
        out_shape=jax.ShapeDtypeStruct((Bpad, Cpad), jnp.float32),
        grid_spec=pltpu.PrefetchScalarGridSpec(
            num_scalar_prefetch=0,
            grid=grid,
            in_specs=[t_spec, p_spec] + [const_spec(w) for w in weights],
            out_specs=out_spec,
        ),
        compiler_params=pltpu.CompilerParams(
            dimension_semantics=("parallel",),
            vmem_limit_bytes=vmem_limit,
        ),
    )(t, p, *weights)

    # TODO(synk): for vocab-scale C on v7x, add a second ("arbitrary") grid axis
    # over Cpad tiles (w2 -> (0, j), b2 -> (0, j), out -> (i, j)) so resident and
    # output blocks stay bounded instead of Hpad x Cpad.
    if slice_output:
        # For large shapes prefer slice_output=False and let the consumer fuse
        # the (B, C) slice; this copy re-reads/re-writes the whole output.
        return out[:B, :C]
    return out


# ----------------------------------------------------------------------------
# Pure-JAX reference (mirrors the PyTorch forward exactly, f32)
# ----------------------------------------------------------------------------
def joint_network_ref(trans_output, pred_output, params):
    x = jnp.concatenate([trans_output, pred_output], axis=1)
    if params.get("w1", None) is not None:
        x = jnp.tanh(x @ params["w1"].T + params["b1"])
    return x @ params["w2"].T + params["b2"]


# ----------------------------------------------------------------------------
# Main
# ----------------------------------------------------------------------------
if __name__ == "__main__":
    # Small, module-consistent shapes.
    batch = 16
    trans_size = 32          # trans_output_size
    pred_size = 32           # pred_output_size
    hidden_size = 64         # hidden_size (> 0 -> jt_nn + tanh path)
    target_size = 40         # target_size
    # dropout_ratio = 0.0 -> nn.Dropout omitted (identity).
    # TODO(synk): dropout with ratio > 0 (training mode) would need pltpu.prng_* masking.

    key = jax.random.PRNGKey(0)
    k_t, k_p, k_w1, k_b1, k_w2, k_b2, k_w2b, k_b2b = jax.random.split(key, 8)

    trans_output = jax.random.normal(k_t, (batch, trans_size), jnp.float32)
    pred_output = jax.random.normal(k_p, (batch, pred_size), jnp.float32)

    # PyTorch nn.Linear convention: weight is [out, in].
    params_hidden = {
        "w1": 0.05 * jax.random.normal(k_w1, (hidden_size, trans_size + pred_size), jnp.float32),
        "b1": 0.01 * jax.random.normal(k_b1, (hidden_size,), jnp.float32),
        "w2": 0.05 * jax.random.normal(k_w2, (target_size, hidden_size), jnp.float32),
        "b2": 0.01 * jax.random.normal(k_b2, (target_size,), jnp.float32),
    }
    params_nohidden = {
        "w1": None,
        "b1": None,
        "w2": 0.05 * jax.random.normal(k_w2b, (target_size, trans_size + pred_size), jnp.float32),
        "b2": 0.01 * jax.random.normal(k_b2b, (target_size,), jnp.float32),
    }

    # One-time parameter packing (not in the per-call hot path).
    prep_h = prepare_joint_params(params_hidden, trans_size, pred_size)
    prep_n = prepare_joint_params(params_nohidden, trans_size, pred_size)

    out_h = jax.block_until_ready(joint_network_forward(trans_output, pred_output, prep_h))
    out_n = jax.block_until_ready(joint_network_forward(trans_output, pred_output, prep_n))

    ref_h = joint_network_ref(trans_output, pred_output, params_hidden)
    ref_n = joint_network_ref(trans_output, pred_output, params_nohidden)

    assert out_h.shape == (batch, target_size)
    assert out_n.shape == (batch, target_size)
    # bf16 matmuls with f32 accumulation -> relaxed tolerance vs the f32 reference.
    assert jnp.allclose(out_h, ref_h, atol=3e-2, rtol=3e-2), "hidden path mismatch vs reference"
    assert jnp.allclose(out_n, ref_n, atol=3e-2, rtol=3e-2), "no-hidden path mismatch vs reference"

    print("KERNEL_OK")
</pallas_src>

<mosaic_0001>
module attributes {stable_mosaic.version = 11 : i64} {
  func.func @_joint_hidden_kernel(%arg0: i32, %arg1: memref<16x32xf32, #tpu.memory_space<vmem>>, %arg2: memref<16x32xf32, #tpu.memory_space<vmem>>, %arg3: memref<32x128xbf16, #tpu.memory_space<vmem>>, %arg4: memref<32x128xbf16, #tpu.memory_space<vmem>>, %arg5: memref<1x128xf32, #tpu.memory_space<vmem>>, %arg6: memref<128x128xbf16, #tpu.memory_space<vmem>>, %arg7: memref<1x128xf32, #tpu.memory_space<vmem>>, %arg8: memref<16x128xf32, #tpu.memory_space<vmem>>) attributes {dimension_semantics = [#tpu.dimension_semantics<parallel>], iteration_bounds = array<i64: 1>, scalar_prefetch = 0 : i64, scratch_operands = 0 : i64, tpu.core_type = #tpu.core_type<tc>, window_params = [{transform_indices = @transform_0, window_bounds = array<i64: 16, 32>}, {transform_indices = @transform_1, window_bounds = array<i64: 16, 32>}, {pipeline_mode = #tpu.pipeline_mode<synchronous>, transform_indices = @transform_2, window_bounds = array<i64: 32, 128>}, {pipeline_mode = #tpu.pipeline_mode<synchronous>, transform_indices = @transform_3, window_bounds = array<i64: 32, 128>}, {pipeline_mode = #tpu.pipeline_mode<synchronous>, transform_indices = @transform_4, window_bounds = array<i64: 1, 128>}, {pipeline_mode = #tpu.pipeline_mode<synchronous>, transform_indices = @transform_5, window_bounds = array<i64: 128, 128>}, {pipeline_mode = #tpu.pipeline_mode<synchronous>, transform_indices = @transform_6, window_bounds = array<i64: 1, 128>}, {transform_indices = @transform_7, window_bounds = array<i64: 16, 128>}]} {
    %c0 = arith.constant 0 : index
    %c0_0 = arith.constant 0 : index
    %0 = vector.load %arg1[%c0, %c0_0] : memref<16x32xf32, #tpu.memory_space<vmem>>, vector<16x32xf32>
    %1 = arith.truncf %0 : vector<16x32xf32> to vector<16x32xbf16>
    %c0_1 = arith.constant 0 : index
    %c0_2 = arith.constant 0 : index
    %2 = vector.load %arg2[%c0_1, %c0_2] : memref<16x32xf32, #tpu.memory_space<vmem>>, vector<16x32xf32>
    %3 = arith.truncf %2 : vector<16x32xf32> to vector<16x32xbf16>
    %c0_3 = arith.constant 0 : index
    %c0_4 = arith.constant 0 : index
    %4 = vector.load %arg3[%c0_3, %c0_4] : memref<32x128xbf16, #tpu.memory_space<vmem>>, vector<32x128xbf16>
    %cst = arith.constant dense<0.000000e+00> : vector<16x128xf32>
    %5 = tpu.matmul %1, %4, %cst {dimension_numbers = #tpu.dot_dimension_numbers<[1], [0], [0], [1], [0, 0, 1, 1], [], []>} : vector<16x32xbf16>, vector<32x128xbf16>, vector<16x128xf32> -> vector<16x128xf32>
    %c0_5 = arith.constant 0 : index
    %c0_6 = arith.constant 0 : index
    %6 = vector.load %arg4[%c0_5, %c0_6] : memref<32x128xbf16, #tpu.memory_space<vmem>>, vector<32x128xbf16>
    %cst_7 = arith.constant dense<0.000000e+00> : vector<16x128xf32>
    %7 = tpu.matmul %3, %6, %cst_7 {dimension_numbers = #tpu.dot_dimension_numbers<[1], [0], [0], [1], [0, 0, 1, 1], [], []>} : vector<16x32xbf16>, vector<32x128xbf16>, vector<16x128xf32> -> vector<16x128xf32>
    %8 = arith.addf %5, %7 : vector<16x128xf32>
    %c0_8 = arith.constant 0 : index
    %c0_9 = arith.constant 0 : index
    %9 = vector.load %arg5[%c0_8, %c0_9] : memref<1x128xf32, #tpu.memory_space<vmem>>, vector<1x128xf32>
    %10 = vector.broadcast %9 : vector<1x128xf32> to vector<16x128xf32>
    %11 = arith.addf %8, %10 : vector<16x128xf32>
    %12 = math.tanh %11 : vector<16x128xf32>
    %13 = arith.truncf %12 : vector<16x128xf32> to vector<16x128xbf16>
    %c0_10 = arith.constant 0 : index
    %c0_11 = arith.constant 0 : index
    %14 = vector.load %arg6[%c0_10, %c0_11] : memref<128x128xbf16, #tpu.memory_space<vmem>>, vector<128x128xbf16>
    %cst_12 = arith.constant dense<0.000000e+00> : vector<16x128xf32>
    %15 = tpu.matmul %13, %14, %cst_12 {dimension_numbers = #tpu.dot_dimension_numbers<[1], [0], [0], [1], [0, 0, 1, 1], [], []>} : vector<16x128xbf16>, vector<128x128xbf16>, vector<16x128xf32> -> vector<16x128xf32>
    %c0_13 = arith.constant 0 : index
    %c0_14 = arith.constant 0 : index
    %16 = vector.load %arg7[%c0_13, %c0_14] : memref<1x128xf32, #tpu.memory_space<vmem>>, vector<1x128xf32>
    %17 = vector.broadcast %16 : vector<1x128xf32> to vector<16x128xf32>
    %18 = arith.addf %15, %17 : vector<16x128xf32>
    %c0_15 = arith.constant 0 : index
    %c0_16 = arith.constant 0 : index
    %19 = vector.load %arg8[%c0_15, %c0_16] : memref<16x128xf32, #tpu.memory_space<vmem>>, vector<16x128xf32>
    tpu.vector_store %arg8[%c0_15, %c0_16], %18 {strides = array<i32>} : memref<16x128xf32, #tpu.memory_space<vmem>>, vector<16x128xf32>,
    return
  }
  func.func @transform_0(%arg0: i32) -> (i32, i32) {
    %c0_i32 = arith.constant 0 : i32
    %c0_i32_0 = arith.constant 0 : i32
    return %arg0, %c0_i32 : i32, i32
  }
  func.func @transform_1(%arg0: i32) -> (i32, i32) {
    %c0_i32 = arith.constant 0 : i32
    %c0_i32_0 = arith.constant 0 : i32
    return %arg0, %c0_i32 : i32, i32
  }
  func.func @transform_2(%arg0: i32) -> (i32, i32) {
    %c0_i32 = arith.constant 0 : i32
    %c0_i32_0 = arith.constant 0 : i32
    %c0_i32_1 = arith.constant 0 : i32
    return %c0_i32, %c0_i32_0 : i32, i32
  }
  func.func @transform_3(%arg0: i32) -> (i32, i32) {
    %c0_i32 = arith.constant 0 : i32
    %c0_i32_0 = arith.constant 0 : i32
    %c0_i32_1 = arith.constant 0 : i32
    return %c0_i32, %c0_i32_0 : i32, i32
  }
  func.func @transform_4(%arg0: i32) -> (i32, i32) {
    %c0_i32 = arith.constant 0 : i32
    %c0_i32_0 = arith.constant 0 : i32
    %c0_i32_1 = arith.constant 0 : i32
    return %c0_i32, %c0_i32_0 : i32, i32
  }
  func.func @transform_5(%arg0: i32) -> (i32, i32) {
    %c0_i32 = arith.constant 0 : i32
    %c0_i32_0 = arith.constant 0 : i32
    %c0_i32_1 = arith.constant 0 : i32
    return %c0_i32, %c0_i32_0 : i32, i32
  }
  func.func @transform_6(%arg0: i32) -> (i32, i32) {
    %c0_i32 = arith.constant 0 : i32
    %c0_i32_0 = arith.constant 0 : i32
    %c0_i32_1 = arith.constant 0 : i32
    return %c0_i32, %c0_i32_0 : i32, i32
  }
  func.func @transform_7(%arg0: i32) -> (i32, i32) {
    %c0_i32 = arith.constant 0 : i32
    %c0_i32_0 = arith.constant 0 : i32
    return %arg0, %c0_i32 : i32, i32
  }
}

</mosaic_0001>

<bundles_post_ra>
// kernel: tpu_custom_call.1
= control target key start
LH: loop header
LB: loop body
LE: loop exit
PB: predicated region body
PF: predicated region fallthrough
CT: control target
= control target key end

     0   :  { %12 = vsyncpa [#allocation3], 0  ;;  %s688_s0 = inlined_call_operand.hbm [shape: f32[16,32], index: 0, kind: input, shape index: {}]   ;;  %s689_s1 = inlined_call_operand.hbm [shape: f32[16,32], index: 1, kind: input, shape index: {}]   ;;  %s690_s2 = inlined_call_operand.hbm [shape: bf16[32,128], index: 2, kind: input, shape index: {}]   ;;  %s691_s3 = inlined_call_operand.hbm [shape: bf16[32,128], index: 3, kind: input, shape index: {}]   ;;  %s692_s4 = inlined_call_operand.vmem [shape: f32[1,128], index: 4, kind: input, shape index: {}]   ;;  %s693_s5 = inlined_call_operand.hbm [shape: bf16[128,128], index: 5, kind: input, shape index: {}]   ;;  %s694_s6 = inlined_call_operand.vmem [shape: f32[1,128], index: 6, kind: input, shape index: {}]   ;;  %s695_s7 = inlined_call_operand.hbm [shape: f32[16,128], index: 7, kind: output, shape index: {}]  }
   0x1   :  { %13 = vsyncpa [#allocation6], 0 }
   0x2   :  { %14 = vsyncpa [#allocation9], 0 }
   0x3   :  { %15 = vsyncpa [#allocation4], 0  ;;  %s591_s24 = smov [#allocation5]  }
   0x4   :  { %s33_s25 = sshll.u32 %s591_s24, 4  ;;  %s34_s25 = int_to_ptr.vmem [resolvable:$true] %s33_s25 }
   0x5   :  { %s471_s26 = scalar_lea.vmem %s34_s25, 256  ;;  %p476_p1 = scmp.lt.s32.totalorder %s34_s25, %s34_s25 }
   0x6   :  { %p472_p0 = scmp.ne.s32.totalorder %s34_s25, %s471_s26  ;;  %p477_p2 = scmp.lt.s32.totalorder %s471_s26, %s471_s26 }
   0x8   :  { %p478_p3 = por %p477_p2, %p476_p1 }
   0xa   :  { %p479_p4 = pnand %p478_p3, %p472_p0 }
   0xc   :  { %482 = shalt.err (!%p479_p4)
}
   0xd   :  { %s592_s27 = smov 128   ;;  %s593_s28 = smov 8  }
   0xe   :  { %39 = dma.hbm_to_vmem [thread:$0]  %s689_s1, 256, %s34_s25, [#allocation6], %s592_s27, %s592_s27, %s593_s28  }
   0xf   :  { %s594_s8 = smov [#allocation8]   ;;  %s595_s10 = smov [#allocation2]  }
  0x10   :  { %s57_s9 = sshll.u32 %s594_s8, 4  ;;  %s21_s11 = sshll.u32 %s595_s10, 4  ;;  %s58_s9 = int_to_ptr.vmem [resolvable:$true] %s57_s9  ;;  %s22_s11 = int_to_ptr.vmem [resolvable:$true] %s21_s11 }
  0x11   :  { %s491_s12 = scalar_lea.vmem %s58_s9, 256  ;;  %p496_p6 = scmp.lt.s32.totalorder %s58_s9, %s58_s9 }
  0x12   :  { %p492_p5 = scmp.ne.s32.totalorder %s58_s9, %s491_s12  ;;  %p497_p7 = scmp.lt.s32.totalorder %s491_s12, %s491_s12 }
  0x14   :  { %p498_p8 = por %p497_p7, %p496_p6 }
  0x16   :  { %p499_p9 = pnand %p498_p8, %p492_p5 }
  0x18   :  { %502 = shalt.err (!%p499_p9)
}
  0x19   :  { %s596_s13 = smov 64   ;;  %s597_s14 = smov 4  }
  0x1a   :  { %63 = dma.hbm_to_vmem [thread:$0]  %s691_s3, 256, %s58_s9, [#allocation9], %s596_s13, %s596_s13, %s597_s14  }
  0x1b   :  { %s511_s1 = scalar_lea.vmem %s22_s11, 256  ;;  %p516_p11 = scmp.lt.s32.totalorder %s22_s11, %s22_s11 }
  0x1c   :  { %p512_p10 = scmp.ne.s32.totalorder %s22_s11, %s511_s1  ;;  %p517_p12 = scmp.lt.s32.totalorder %s511_s1, %s511_s1 }
  0x1e   :  { %p518_p13 = por %p517_p12, %p516_p11 }
  0x20   :  { %p519_p0 = pnand %p518_p13, %p512_p10 }
  0x22   :  { %522 = shalt.err (!%p519_p0)
}
  0x23   :  { %27 = dma.hbm_to_vmem [thread:$0]  %s688_s0, 256, %s22_s11, [#allocation3], %s592_s27, %s592_s27, %s593_s28  }
  0x24   :  { %s598_s19 = smov [#allocation7]   ;;  %s599_s21 = smov [#allocation10]  }
  0x25   :  { %s45_s20 = sshll.u32 %s598_s19, 4  ;;  %s71_s3 = sshll.u32 %s599_s21, 4  ;;  %s46_s20 = int_to_ptr.vmem [resolvable:$true] %s45_s20  ;;  %s72_s3 = int_to_ptr.vmem [resolvable:$true] %s71_s3 }
  0x26   :  { %s531_s22 = scalar_lea.vmem %s46_s20, 256  ;;  %p536_p2 = scmp.lt.s32.totalorder %s46_s20, %s46_s20 }
  0x27   :  { %p532_p1 = scmp.ne.s32.totalorder %s46_s20, %s531_s22  ;;  %p537_p3 = scmp.lt.s32.totalorder %s531_s22, %s531_s22 }
  0x29   :  { %p538_p4 = por %p537_p3, %p536_p2 }
  0x2b   :  { %p539_p5 = pnand %p538_p4, %p532_p1 }
  0x2d   :  { %542 = shalt.err (!%p539_p5)
}
  0x2e   :  { %51 = dma.hbm_to_vmem [thread:$0]  %s690_s2, 256, %s46_s20, [#allocation6], %s596_s13, %s596_s13, %s597_s14  }
  0x2f   :  { %s551_s0 = scalar_lea.vmem %s72_s3, 1024  ;;  %p556_p7 = scmp.lt.s32.totalorder %s72_s3, %s72_s3 }
  0x30   :  { %p552_p6 = scmp.ne.s32.totalorder %s72_s3, %s551_s0  ;;  %p557_p8 = scmp.lt.s32.totalorder %s551_s0, %s551_s0 }
  0x32   :  { %p558_p9 = por %p557_p8, %p556_p7 }
  0x34   :  { %p559_p10 = pnand %p558_p9, %p552_p6 }
  0x36   :  { %562 = shalt.err (!%p559_p10)
}
  0x37   :  { %77 = dma.hbm_to_vmem [thread:$0]  %s693_s5, 1024, %s72_s3, [#allocation9], %s596_s13, %s596_s13, %s597_s14  }
  0x38   :  { %583 = dma.done.wait [#allocation3], 256  }
  0x39   :  { %584 = vsyncadd [#allocation3], 4294967040 }
  0x3a   :  { %585 = dma.done.wait [#allocation6], 512  }
  0x3b   :  { %586 = vsyncadd [#allocation6], 4294966784 }
  0x3c   :  { %587 = dma.done.wait [#allocation9], 1280  }
  0x3d   :  { %588 = vsyncadd [#allocation9], 4294966016  ;;  %v600_v0 = vmov 0.0   ;;  %vm601_vm0 = vmmov 0   ;;  %v447_v1 = vld [vmem:[#allocation8 + $0x8] sm:$0xff]   ;;  %v448_v2 = vld [vmem:[#allocation8] sm:$0xff]  }
  0x3e   :  { %399 = vmatprep.subr.bf16.mxu1 %v600_v0  ;;  %403 = vmatprep.mubr.msk.bf16.mxu1 %vm601_vm0, %v600_v0  ;;  %v99_v3 = vld [vmem:[#allocation5] sm:$0xff]  ;;  %v100_v4 = vld [vmem:[#allocation5 + $0x8] sm:$0xff]  ;;  %vm122_vm1 = vcmask 261120   ;;  %v449_v6 = vld [vmem:[#allocation7 + $0x8] sm:$0xff]  }
  0x3f   :  { %415 = vmatprep.subr.bf16.mxu0 %v600_v0  ;;  %431 = vmatprep.mubr.msk.bf16.mxu0 %vm601_vm0, %v600_v0  ;;  %v101_v5 = vpack.c.bf16 %v100_v4, %v99_v3  ;;  %v450_v7 = vld [vmem:[#allocation7] sm:$0xff]   ;;  %v97_v9 = vld [vmem:[#allocation2 + $0x8] sm:$0xff]  ;;  %v451_v11 = vld [vmem:[#allocation10 + $0x38] sm:$0xff]  }
  0x40   :  { %400 = vmatpush3.bf16.msra.mxu1 %v447_v1  ;;  %v96_v8 = vld [vmem:[#allocation2] sm:$0xff]  ;;  %416 = vmatpush3.bf16.msra.mxu0 %v451_v11  ;;  %v452_v12 = vld [vmem:[#allocation10 + $0x30] sm:$0xff]   ;;  %v453_v13 = vld [vmem:[#allocation10 + $0x28] sm:$0xff]  }
  0x41   :  { %401 = vmatprep.subr.bf16.mxu1 %v600_v0  ;;  %v98_v10 = vpack.c.bf16 %v97_v9, %v96_v8  ;;  %417 = vmatprep.subr.bf16.mxu0 %v600_v0  ;;  %v454_v14 = vld [vmem:[#allocation10 + $0x20] sm:$0xff]   ;;  %v455_v15 = vld [vmem:[#allocation10 + $0x18] sm:$0xff]   ;;  %v456_v16 = vld [vmem:[#allocation10 + $0x10] sm:$0xff]  }
  0x42   :  { %v457_v17 = vld [vmem:[#allocation10 + $0x8] sm:$0xff]   ;;  %v458_v18 = vld [vmem:[#allocation10] sm:$0xff]  }
  0x43   :  { %v374_v25 = vld [vmem:[%s692_s4] ss:$0 sm:$0xff]  ;;  %s602_s4 = smov [#allocation11]  }
  0x44   :  { %402 = vmatpush3.bf16.msra.mxu1 %v448_v2  ;;  %418 = vmatpush3.bf16.msra.mxu0 %v452_v12  ;;  %v375_v35 = vld [vmem:[%s694_s6] ss:$0 sm:$0xff]  ;;  %s354_s8 = sshll.u32 %s602_s4, 4  ;;  %s355_s8 = int_to_ptr.vmem [resolvable:$true] %s354_s8 }
  0x45   :  { %407 = vmatprep.subr.bf16.mxu1 %v600_v0  ;;  %419 = vmatprep.subr.bf16.mxu0 %v600_v0  ;;  %s563_s9 = scalar_lea.vmem %s355_s8, 256  ;;  %p568_p12 = scmp.lt.s32.totalorder %s355_s8, %s355_s8 }
  0x46   :  { %p564_p11 = scmp.ne.s32.totalorder %s355_s8, %s563_s9  ;;  %p569_p13 = scmp.lt.s32.totalorder %s563_s9, %s563_s9 }
  0x47   :  { %404 = vmatmul.mubr.msk.bf16.vlgmr.msra.gmra.mxu1 %vm122_vm1, %v101_v5 }
  0x48   :  { %408 = vmatpush3.bf16.msra.mxu1 %v449_v6  ;;  %411 = vmatprep.mubr.msk.bf16.mxu1 %vm601_vm0, %v600_v0  ;;  %p570_p0 = por %p569_p13, %p568_p12 }
  0x49   :  { %409 = vmatprep.subr.bf16.mxu1 %v600_v0  ;;  %420 = vmatpush3.bf16.msra.mxu0 %v453_v13 }
  0x4a   :  { %421 = vmatprep.subr.bf16.mxu0 %v600_v0  ;;  %p571_p1 = pnand %p570_p0, %p564_p11 }
  0x4c   :  { %410 = vmatpush3.bf16.msra.mxu1 %v450_v7 }
  0x4d   :  { %422 = vmatpush3.bf16.msra.mxu0 %v454_v14 }
  0x4e   :  { %423 = vmatprep.subr.bf16.mxu0 %v600_v0 }
  0x4f   :  { %412 = vmatmul.mubr.msk.bf16.vlgmr.msra.gmra.mxu1 %vm122_vm1, %v98_v10 }
  0x51   :  { %424 = vmatpush3.bf16.msra.mxu0 %v455_v15 }
  0x52   :  { %425 = vmatprep.subr.bf16.mxu0 %v600_v0 }
  0x55   :  { %426 = vmatpush3.bf16.msra.mxu0 %v456_v16 }
  0x56   :  { %427 = vmatprep.subr.bf16.mxu0 %v600_v0 }
  0x59   :  { %428 = vmatpush3.bf16.msra.mxu0 %v457_v17 }
  0x5a   :  { %429 = vmatprep.subr.bf16.mxu0 %v600_v0 }
  0x5d   :  { %430 = vmatpush3.bf16.msra.mxu0 %v458_v18 }
 0x107   :  { %v160_v19 = vpop.f32.mrf.mxu1 }
 0x109   :  { %v405_v20 = vpop.f32.mrf.mxu1 }
 0x10b   :  { %v163_v21 = vpop.f32.mrf.mxu1 }
 0x10d   :  { %v406_v22 = vpop.f32.mrf.mxu1 }
 0x10f   :  { %v216_v23 = vpop.f32.mrf.mxu1 }
 0x110   :  { %v217_v24 = vadd.f32 %v216_v23, %v160_v19 }
 0x111   :  { %v413_v26 = vpop.f32.mrf.mxu1 }
 0x112   :  { %v230_v27 = vadd.f32 %v374_v25, %v217_v24 }
 0x113   :  { %v219_v28 = vpop.f32.mrf.mxu1 }
 0x114   :  { %v220_v29 = vadd.f32 %v219_v28, %v163_v21  ;;  %459 = vtanh.f32 %v230_v27 }
 0x115   :  { %v414_v30 = vpop.f32.mrf.mxu1 }
 0x116   :  { %v231_v31 = vadd.f32 %v374_v25, %v220_v29 }
 0x118   :  { %461 = vtanh.f32 %v231_v31 }
 0x121   :  { %v460_v32 = vpop.eup %459 }
 0x125   :  { %v462_v33 = vpop.eup %461 }
 0x126   :  { %v234_v34 = vpack.c.bf16 %v462_v33, %v460_v32 }
 0x128   :  { %432 = vmatmul.mubr.bf16.vlgmr.msra.gmra.mxu0 %v234_v34 }
 0x1e8   :  { %v340_v36 = vpop.f32.mrf.mxu0 }
 0x1e9   :  { %v341_v37 = vadd.f32 %v375_v35, %v340_v36 }
 0x1ea   :  { %v433_v38 = vpop.f32.mrf.mxu0 }
 0x1eb   :  { %347 = vst [vmem:[#allocation11] sm:$0xff] %v341_v37 }
 0x1ec   :  { %v343_v39 = vpop.f32.mrf.mxu0 }
 0x1ed   :  { %v344_v40 = vadd.f32 %v375_v35, %v343_v39 }
 0x1ee   :  { %v434_v41 = vpop.f32.mrf.mxu0 }
 0x1ef   :  { %348 = vst [vmem:[#allocation11 + $0x8] sm:$0xff] %v344_v40 }
 0x1f0   :  { %574 = shalt.err (!%p571_p1)
}
 0x1f1   :  { %360 = dma.vmem_to_hbm [thread:$0]  %s355_s8, 256, %s695_s7, [#allocation4], %s592_s27, %s592_s27, %s593_s28  }
 0x1f2   :  { %589 = dma.done.wait [#allocation4], 256  }
 0x1f3   :  { %590 = vsyncadd [#allocation4], 4294967040 }
 0x1f4   :  { %364 = vsyncpa [#allocation3], 1 }
 0x1f5   :  { %365 = vsyncpa [#allocation6], 1 }
 0x1f6   :  { %366 = vsyncpa [#allocation9], 1 }
 0x1f7   :  { %367 = vsyncpa [#allocation4], 1 }

</bundles_post_ra>
